<compile_context>
chip_gen: v7x
topology: tpu7x:2x2x1
jax: 0.10.0
libtpu: 0.0.40
codegen_flags: <defaults>
</compile_context>

<pallas_src>
import numpy as np
import jax
import jax.numpy as jnp
from jax.experimental import pallas as pl
from jax.experimental.pallas import tpu as pltpu

BN_EPS = 1e-5
N_PAR = 4   # 2x2 output parities of the stride-2 transposed conv


# ----------------------------- Pallas kernel -----------------------------
def decnn_cell_kernel(pt_ref, wt_ref, gb_ref, o_ref):
    """One DeCnnCell: deconv (4 polyphase matmuls) + training-mode BN + tanh.

    pt_ref : (4, K, M)   bf16  transposed im2col patches per output parity
    wt_ref : (4, C, K)   bf16  transposed 2x2 sub-kernels per output parity
    gb_ref : (C, 2)      f32   packed per-channel (gamma, beta)
    o_ref  : (4, C, M)   f32   parity-major output, lane axis = M (lane dense)
    """
    # MXU: native bf16 x bf16 with f32 accumulation.
    ys = [jnp.dot(wt_ref[p], pt_ref[p], preferred_element_type=jnp.float32)
          for p in range(N_PAR)]

    # BatchNorm2d training-mode biased stats over (N, H_out, W_out)
    # == over (parity, M).  Reductions are cross-lane (XLU).
    m = ys[0].shape[1]
    inv_count = 1.0 / (N_PAR * m)
    s1 = ys[0].sum(axis=1, keepdims=True)
    for p in range(1, N_PAR):
        s1 = s1 + ys[p].sum(axis=1, keepdims=True)
    mean = s1 * inv_count
    s2 = jnp.square(ys[0] - mean).sum(axis=1, keepdims=True)
    for p in range(1, N_PAR):
        s2 = s2 + jnp.square(ys[p] - mean).sum(axis=1, keepdims=True)
    var = s2 * inv_count

    # Fused affine: scale = gamma*rsqrt(var+eps), shift = beta - mean*scale.
    # ConvTranspose bias is per-channel constant -> exactly cancelled by the
    # mean subtraction, so it is not computed here.
    gamma = gb_ref[:, 0:1]
    beta = gb_ref[:, 1:2]
    scale = gamma * jax.lax.rsqrt(var + BN_EPS)
    shift = beta - mean * scale
    for p in range(N_PAR):
        o_ref[p] = jnp.tanh(ys[p] * scale + shift)


def decnn_cell_pallas(pt, wt, gb):
    n_par, k, m = pt.shape
    c_out = wt.shape[1]
    return pl.pallas_call(
        decnn_cell_kernel,
        out_shape=jax.ShapeDtypeStruct((n_par, c_out, m), jnp.float32),
        grid=(1,),
        in_specs=[
            pl.BlockSpec((n_par, k, m), lambda i: (0, 0, 0)),
            pl.BlockSpec((n_par, c_out, k), lambda i: (0, 0, 0)),
            pl.BlockSpec((c_out, 2), lambda i: (0, 0)),
        ],
        out_specs=pl.BlockSpec((n_par, c_out, m), lambda i: (0, 0, 0)),
        compiler_params=pltpu.CompilerParams(
            dimension_semantics=("arbitrary",)),
    )(pt, wt, gb)


# ------------------------------ JAX glue ---------------------------------
def build_patches_t(x_cnhw):
    """Transposed polyphase im2col.

    x_cnhw: (C, N, H, W) f32.  Returns (4, 4*C, N*H*W) bf16 where
    parity p = 2*ph + pw, K index = tap*C + c with tap = 2*wr + wc, and the
    2x2 window for parity (ph, pw) starts at padded offset (ph+wr, pw+wc).
    """
    C, N, H, W = x_cnhw.shape
    xp = jnp.pad(x_cnhw, ((0, 0), (0, 0), (1, 1), (1, 1)))
    pts = []
    for ph in range(2):
        for pw in range(2):
            taps = [xp[:, :, ph + wr: ph + wr + H, pw + wc: pw + wc + W]
                    for wr in range(2) for wc in range(2)]
            t = jnp.stack(taps, axis=0)               # (4, C, N, H, W)
            pts.append(t.reshape(4 * C, N * H * W))
    return jnp.stack(pts, axis=0).astype(jnp.bfloat16)


def build_weight_t(w):
    """PyTorch ConvTranspose2d weight (C_in, C_out, 4, 4) -> per-parity
    transposed 2x2 sub-kernel matrices (4, C_out, 4*C_in) in bf16.
    Tap (wr, wc) of parity (ph, pw) maps to kernel index
    kh = 3 - ph - 2*wr, kw = 3 - pw - 2*wc."""
    c_in, c_out = w.shape[0], w.shape[1]
    wts = []
    for ph in range(2):
        for pw in range(2):
            taps = [w[:, :, 3 - ph - 2 * wr, 3 - pw - 2 * wc]
                    for wr in range(2) for wc in range(2)]
            wk = jnp.stack(taps, axis=0).reshape(4 * c_in, c_out)
            wts.append(wk.T)                          # (C_out, 4*C_in)
    return jnp.stack(wts, axis=0).astype(jnp.bfloat16)


def decoder_forward(x_nchw, params):
    x = jnp.transpose(x_nchw, (1, 0, 2, 3))           # NCHW -> (C, N, H, W)
    for (w, _b, gamma, beta) in params:               # bias cancels under BN
        C, N, H, W = x.shape
        c_out = w.shape[1]
        pt = build_patches_t(x)                       # (4, 4*C, N*H*W) bf16
        wt = build_weight_t(w)                        # (4, c_out, 4*C) bf16
        gb = jnp.stack([gamma, beta], axis=1)         # (c_out, 2) f32
        o = decnn_cell_pallas(pt, wt, gb)             # (4, c_out, N*H*W) f32
        # Interleave the 4 parities back into the full-resolution map.
        y = o.reshape(2, 2, c_out, N, H, W).transpose(2, 3, 4, 0, 5, 1)
        x = y.reshape(c_out, N, 2 * H, 2 * W)
    return jnp.transpose(x, (1, 0, 2, 3))             # (C, N, H, W) -> NCHW


# --------------------------- pure-JAX reference ---------------------------
def decoder_reference(x_nchw, params):
    x = x_nchw
    for (w, b, gamma, beta) in params:
        wc = jnp.flip(w, axis=(2, 3)).transpose(1, 0, 2, 3)   # (C_out,C_in,4,4)
        y = jax.lax.conv_general_dilated(
            x, wc, window_strides=(1, 1), padding=((2, 2), (2, 2)),
            lhs_dilation=(2, 2), dimension_numbers=("NCHW", "OIHW", "NCHW"),
            precision=jax.lax.Precision.HIGHEST)
        y = y + b[None, :, None, None]
        mean = jnp.mean(y, axis=(0, 2, 3), keepdims=True)
        var = jnp.mean(jnp.square(y - mean), axis=(0, 2, 3), keepdims=True)
        y = (y - mean) * jax.lax.rsqrt(var + BN_EPS)
        x = jnp.tanh(y * gamma[None, :, None, None] + beta[None, :, None, None])
    return x


# ------------------------------ param init --------------------------------
def init_params(channels, key):
    """Mirror Decoder.__init__: cells over (channels[-i], channels[-(i+1)]).
    gamma/beta are perturbed from the BatchNorm defaults (1, 0) purely to
    exercise the affine path; forward semantics are identical."""
    params = []
    ch = list(channels)
    for i in range(1, len(ch)):
        c_in, c_out = ch[-i], ch[-(i + 1)]
        key, k1, k2, k3, k4 = jax.random.split(key, 5)
        w = jax.random.normal(k1, (c_in, c_out, 4, 4), jnp.float32) * 0.1
        b = jax.random.normal(k2, (c_out,), jnp.float32) * 0.1
        gamma = 1.0 + 0.1 * jax.random.normal(k3, (c_out,), jnp.float32)
        beta = 0.1 * jax.random.normal(k4, (c_out,), jnp.float32)
        params.append((w, b, gamma, beta))
    return params


if __name__ == "__main__":
    channels = [4, 8, 16]                 # Decoder([4, 8, 16]): 16 -> 8 -> 4
    N, H, W = 2, 4, 4
    key = jax.random.PRNGKey(0)
    key, kx = jax.random.split(key)
    x = jax.random.normal(kx, (N, channels[-1], H, W), jnp.float32)   # NCHW

    params = init_params(channels, jax.random.PRNGKey(1))

    out = decoder_forward(x, params)
    out = jax.block_until_ready(out)
    assert out.shape == (N, channels[0], 4 * H, 4 * W), out.shape

    ref = jax.block_until_ready(decoder_reference(x, params))
    # bf16 MXU operands (f32 accumulation) vs full-f32 reference -> loose-ish
    # tolerance; any structural bug (wrong tap/parity/flip) would be O(1) off.
    np.testing.assert_allclose(np.asarray(out), np.asarray(ref),
                               rtol=3e-2, atol=3e-2)
    print("KERNEL_OK")
</pallas_src>

<mosaic_0001>
module attributes {stable_mosaic.version = 11 : i64} {
  func.func @decnn_cell_kernel(%arg0: i32, %arg1: memref<4x64x32xbf16, #tpu.memory_space<vmem>>, %arg2: memref<4x8x64xbf16, #tpu.memory_space<vmem>>, %arg3: memref<8x2xf32, #tpu.memory_space<vmem>>, %arg4: memref<4x8x32xf32, #tpu.memory_space<vmem>>) attributes {dimension_semantics = [#tpu.dimension_semantics<arbitrary>], iteration_bounds = array<i64: 1>, scalar_prefetch = 0 : i64, scratch_operands = 0 : i64, tpu.core_type = #tpu.core_type<tc>, window_params = [{pipeline_mode = #tpu.pipeline_mode<synchronous>, transform_indices = @transform_0, window_bounds = array<i64: 4, 64, 32>}, {pipeline_mode = #tpu.pipeline_mode<synchronous>, transform_indices = @transform_1, window_bounds = array<i64: 4, 8, 64>}, {pipeline_mode = #tpu.pipeline_mode<synchronous>, transform_indices = @transform_2, window_bounds = array<i64: 8, 2>}, {pipeline_mode = #tpu.pipeline_mode<synchronous>, transform_indices = @transform_3, window_bounds = array<i64: 4, 8, 32>}]} {
    %c0 = arith.constant 0 : index
    %c0_0 = arith.constant 0 : index
    %c0_1 = arith.constant 0 : index
    %0 = vector.load %arg2[%c0, %c0_0, %c0_1] : memref<4x8x64xbf16, #tpu.memory_space<vmem>>, vector<1x8x64xbf16>
    %1 = vector.shape_cast %0 : vector<1x8x64xbf16> to vector<8x64xbf16>
    %c0_2 = arith.constant 0 : index
    %c0_3 = arith.constant 0 : index
    %c0_4 = arith.constant 0 : index
    %2 = vector.load %arg1[%c0_2, %c0_3, %c0_4] : memref<4x64x32xbf16, #tpu.memory_space<vmem>>, vector<1x64x32xbf16>
    %3 = vector.shape_cast %2 : vector<1x64x32xbf16> to vector<64x32xbf16>
    %cst = arith.constant dense<0.000000e+00> : vector<8x32xf32>
    %4 = tpu.matmul %1, %3, %cst {dimension_numbers = #tpu.dot_dimension_numbers<[1], [0], [0], [1], [0, 0, 1, 1], [], []>} : vector<8x64xbf16>, vector<64x32xbf16>, vector<8x32xf32> -> vector<8x32xf32>
    %c1 = arith.constant 1 : index
    %c0_5 = arith.constant 0 : index
    %c0_6 = arith.constant 0 : index
    %5 = vector.load %arg2[%c1, %c0_5, %c0_6] : memref<4x8x64xbf16, #tpu.memory_space<vmem>>, vector<1x8x64xbf16>
    %6 = vector.shape_cast %5 : vector<1x8x64xbf16> to vector<8x64xbf16>
    %c1_7 = arith.constant 1 : index
    %c0_8 = arith.constant 0 : index
    %c0_9 = arith.constant 0 : index
    %7 = vector.load %arg1[%c1_7, %c0_8, %c0_9] : memref<4x64x32xbf16, #tpu.memory_space<vmem>>, vector<1x64x32xbf16>
    %8 = vector.shape_cast %7 : vector<1x64x32xbf16> to vector<64x32xbf16>
    %cst_10 = arith.constant dense<0.000000e+00> : vector<8x32xf32>
    %9 = tpu.matmul %6, %8, %cst_10 {dimension_numbers = #tpu.dot_dimension_numbers<[1], [0], [0], [1], [0, 0, 1, 1], [], []>} : vector<8x64xbf16>, vector<64x32xbf16>, vector<8x32xf32> -> vector<8x32xf32>
    %c2 = arith.constant 2 : index
    %c0_11 = arith.constant 0 : index
    %c0_12 = arith.constant 0 : index
    %10 = vector.load %arg2[%c2, %c0_11, %c0_12] : memref<4x8x64xbf16, #tpu.memory_space<vmem>>, vector<1x8x64xbf16>
    %11 = vector.shape_cast %10 : vector<1x8x64xbf16> to vector<8x64xbf16>
    %c2_13 = arith.constant 2 : index
    %c0_14 = arith.constant 0 : index
    %c0_15 = arith.constant 0 : index
    %12 = vector.load %arg1[%c2_13, %c0_14, %c0_15] : memref<4x64x32xbf16, #tpu.memory_space<vmem>>, vector<1x64x32xbf16>
    %13 = vector.shape_cast %12 : vector<1x64x32xbf16> to vector<64x32xbf16>
    %cst_16 = arith.constant dense<0.000000e+00> : vector<8x32xf32>
    %14 = tpu.matmul %11, %13, %cst_16 {dimension_numbers = #tpu.dot_dimension_numbers<[1], [0], [0], [1], [0, 0, 1, 1], [], []>} : vector<8x64xbf16>, vector<64x32xbf16>, vector<8x32xf32> -> vector<8x32xf32>
    %c3 = arith.constant 3 : index
    %c0_17 = arith.constant 0 : index
    %c0_18 = arith.constant 0 : index
    %15 = vector.load %arg2[%c3, %c0_17, %c0_18] : memref<4x8x64xbf16, #tpu.memory_space<vmem>>, vector<1x8x64xbf16>
    %16 = vector.shape_cast %15 : vector<1x8x64xbf16> to vector<8x64xbf16>
    %c3_19 = arith.constant 3 : index
    %c0_20 = arith.constant 0 : index
    %c0_21 = arith.constant 0 : index
    %17 = vector.load %arg1[%c3_19, %c0_20, %c0_21] : memref<4x64x32xbf16, #tpu.memory_space<vmem>>, vector<1x64x32xbf16>
    %18 = vector.shape_cast %17 : vector<1x64x32xbf16> to vector<64x32xbf16>
    %cst_22 = arith.constant dense<0.000000e+00> : vector<8x32xf32>
    %19 = tpu.matmul %16, %18, %cst_22 {dimension_numbers = #tpu.dot_dimension_numbers<[1], [0], [0], [1], [0, 0, 1, 1], [], []>} : vector<8x64xbf16>, vector<64x32xbf16>, vector<8x32xf32> -> vector<8x32xf32>
    %cst_23 = arith.constant dense<0.000000e+00> : vector<8xf32>
    %20 = vector.multi_reduction <add>, %4, %cst_23 [1] : vector<8x32xf32> to vector<8xf32>
    %21 = vector.shape_cast %20 : vector<8xf32> to vector<8x1xf32>
    %cst_24 = arith.constant dense<0.000000e+00> : vector<8xf32>
    %22 = vector.multi_reduction <add>, %9, %cst_24 [1] : vector<8x32xf32> to vector<8xf32>
    %23 = vector.shape_cast %22 : vector<8xf32> to vector<8x1xf32>
    %24 = arith.addf %21, %23 : vector<8x1xf32>
    %cst_25 = arith.constant dense<0.000000e+00> : vector<8xf32>
    %25 = vector.multi_reduction <add>, %14, %cst_25 [1] : vector<8x32xf32> to vector<8xf32>
    %26 = vector.shape_cast %25 : vector<8xf32> to vector<8x1xf32>
    %27 = arith.addf %24, %26 : vector<8x1xf32>
    %cst_26 = arith.constant dense<0.000000e+00> : vector<8xf32>
    %28 = vector.multi_reduction <add>, %19, %cst_26 [1] : vector<8x32xf32> to vector<8xf32>
    %29 = vector.shape_cast %28 : vector<8xf32> to vector<8x1xf32>
    %30 = arith.addf %27, %29 : vector<8x1xf32>
    %cst_27 = arith.constant 7.812500e-03 : f32
    %31 = vector.broadcast %cst_27 : f32 to vector<8x1xf32>
    %32 = arith.mulf %30, %31 : vector<8x1xf32>
    %33 = vector.broadcast %32 : vector<8x1xf32> to vector<8x32xf32>
    %34 = arith.subf %4, %33 : vector<8x32xf32>
    %35 = arith.mulf %34, %34 : vector<8x32xf32>
    %cst_28 = arith.constant dense<0.000000e+00> : vector<8xf32>
    %36 = vector.multi_reduction <add>, %35, %cst_28 [1] : vector<8x32xf32> to vector<8xf32>
    %37 = vector.shape_cast %36 : vector<8xf32> to vector<8x1xf32>
    %38 = vector.broadcast %32 : vector<8x1xf32> to vector<8x32xf32>
    %39 = arith.subf %9, %38 : vector<8x32xf32>
    %40 = arith.mulf %39, %39 : vector<8x32xf32>
    %cst_29 = arith.constant dense<0.000000e+00> : vector<8xf32>
    %41 = vector.multi_reduction <add>, %40, %cst_29 [1] : vector<8x32xf32> to vector<8xf32>
    %42 = vector.shape_cast %41 : vector<8xf32> to vector<8x1xf32>
    %43 = arith.addf %37, %42 : vector<8x1xf32>
    %44 = vector.broadcast %32 : vector<8x1xf32> to vector<8x32xf32>
    %45 = arith.subf %14, %44 : vector<8x32xf32>
    %46 = arith.mulf %45, %45 : vector<8x32xf32>
    %cst_30 = arith.constant dense<0.000000e+00> : vector<8xf32>
    %47 = vector.multi_reduction <add>, %46, %cst_30 [1] : vector<8x32xf32> to vector<8xf32>
    %48 = vector.shape_cast %47 : vector<8xf32> to vector<8x1xf32>
    %49 = arith.addf %43, %48 : vector<8x1xf32>
    %50 = vector.broadcast %32 : vector<8x1xf32> to vector<8x32xf32>
    %51 = arith.subf %19, %50 : vector<8x32xf32>
    %52 = arith.mulf %51, %51 : vector<8x32xf32>
    %cst_31 = arith.constant dense<0.000000e+00> : vector<8xf32>
    %53 = vector.multi_reduction <add>, %52, %cst_31 [1] : vector<8x32xf32> to vector<8xf32>
    %54 = vector.shape_cast %53 : vector<8xf32> to vector<8x1xf32>
    %55 = arith.addf %49, %54 : vector<8x1xf32>
    %cst_32 = arith.constant 7.812500e-03 : f32
    %56 = vector.broadcast %cst_32 : f32 to vector<8x1xf32>
    %57 = arith.mulf %55, %56 : vector<8x1xf32>
    %c0_33 = arith.constant 0 : index
    %c0_34 = arith.constant 0 : index
    %58 = vector.load %arg3[%c0_33, %c0_34] : memref<8x2xf32, #tpu.memory_space<vmem>>, vector<8x1xf32>
    %c0_35 = arith.constant 0 : index
    %c1_36 = arith.constant 1 : index
    %59 = vector.load %arg3[%c0_35, %c1_36] : memref<8x2xf32, #tpu.memory_space<vmem>>, vector<8x1xf32>
    %cst_37 = arith.constant 9.99999974E-6 : f32
    %60 = vector.broadcast %cst_37 : f32 to vector<8x1xf32>
    %61 = arith.addf %57, %60 : vector<8x1xf32>
    %62 = math.rsqrt %61 : vector<8x1xf32>
    %63 = arith.mulf %58, %62 : vector<8x1xf32>
    %64 = arith.mulf %32, %63 : vector<8x1xf32>
    %65 = arith.subf %59, %64 : vector<8x1xf32>
    %66 = vector.broadcast %63 : vector<8x1xf32> to vector<8x32xf32>
    %67 = arith.mulf %4, %66 : vector<8x32xf32>
    %68 = vector.broadcast %65 : vector<8x1xf32> to vector<8x32xf32>
    %69 = arith.addf %67, %68 : vector<8x32xf32>
    %70 = math.tanh %69 : vector<8x32xf32>
    %c0_38 = arith.constant 0 : index
    %c0_39 = arith.constant 0 : index
    %c0_40 = arith.constant 0 : index
    %71 = vector.load %arg4[%c0_38, %c0_39, %c0_40] : memref<4x8x32xf32, #tpu.memory_space<vmem>>, vector<1x8x32xf32>
    %72 = vector.shape_cast %71 : vector<1x8x32xf32> to vector<8x32xf32>
    %73 = vector.shape_cast %70 : vector<8x32xf32> to vector<1x8x32xf32>
    tpu.vector_store %arg4[%c0_38, %c0_39, %c0_40], %73 {strides = array<i32>} : memref<4x8x32xf32, #tpu.memory_space<vmem>>, vector<1x8x32xf32>,
    %74 = vector.broadcast %63 : vector<8x1xf32> to vector<8x32xf32>
    %75 = arith.mulf %9, %74 : vector<8x32xf32>
    %76 = vector.broadcast %65 : vector<8x1xf32> to vector<8x32xf32>
    %77 = arith.addf %75, %76 : vector<8x32xf32>
    %78 = math.tanh %77 : vector<8x32xf32>
    %c1_41 = arith.constant 1 : index
    %c0_42 = arith.constant 0 : index
    %c0_43 = arith.constant 0 : index
    %79 = vector.load %arg4[%c1_41, %c0_42, %c0_43] : memref<4x8x32xf32, #tpu.memory_space<vmem>>, vector<1x8x32xf32>
    %80 = vector.shape_cast %79 : vector<1x8x32xf32> to vector<8x32xf32>
    %81 = vector.shape_cast %78 : vector<8x32xf32> to vector<1x8x32xf32>
    tpu.vector_store %arg4[%c1_41, %c0_42, %c0_43], %81 {strides = array<i32>} : memref<4x8x32xf32, #tpu.memory_space<vmem>>, vector<1x8x32xf32>,
    %82 = vector.broadcast %63 : vector<8x1xf32> to vector<8x32xf32>
    %83 = arith.mulf %14, %82 : vector<8x32xf32>
    %84 = vector.broadcast %65 : vector<8x1xf32> to vector<8x32xf32>
    %85 = arith.addf %83, %84 : vector<8x32xf32>
    %86 = math.tanh %85 : vector<8x32xf32>
    %c2_44 = arith.constant 2 : index
    %c0_45 = arith.constant 0 : index
    %c0_46 = arith.constant 0 : index
    %87 = vector.load %arg4[%c2_44, %c0_45, %c0_46] : memref<4x8x32xf32, #tpu.memory_space<vmem>>, vector<1x8x32xf32>
    %88 = vector.shape_cast %87 : vector<1x8x32xf32> to vector<8x32xf32>
    %89 = vector.shape_cast %86 : vector<8x32xf32> to vector<1x8x32xf32>
    tpu.vector_store %arg4[%c2_44, %c0_45, %c0_46], %89 {strides = array<i32>} : memref<4x8x32xf32, #tpu.memory_space<vmem>>, vector<1x8x32xf32>,
    %90 = vector.broadcast %63 : vector<8x1xf32> to vector<8x32xf32>
    %91 = arith.mulf %19, %90 : vector<8x32xf32>
    %92 = vector.broadcast %65 : vector<8x1xf32> to vector<8x32xf32>
    %93 = arith.addf %91, %92 : vector<8x32xf32>
    %94 = math.tanh %93 : vector<8x32xf32>
    %c3_47 = arith.constant 3 : index
    %c0_48 = arith.constant 0 : index
    %c0_49 = arith.constant 0 : index
    %95 = vector.load %arg4[%c3_47, %c0_48, %c0_49] : memref<4x8x32xf32, #tpu.memory_space<vmem>>, vector<1x8x32xf32>
    %96 = vector.shape_cast %95 : vector<1x8x32xf32> to vector<8x32xf32>
    %97 = vector.shape_cast %94 : vector<8x32xf32> to vector<1x8x32xf32>
    tpu.vector_store %arg4[%c3_47, %c0_48, %c0_49], %97 {strides = array<i32>} : memref<4x8x32xf32, #tpu.memory_space<vmem>>, vector<1x8x32xf32>,
    return
  }
  func.func @transform_0(%arg0: i32) -> (i32, i32, i32) {
    %c0_i32 = arith.constant 0 : i32
    %c0_i32_0 = arith.constant 0 : i32
    %c0_i32_1 = arith.constant 0 : i32
    %c0_i32_2 = arith.constant 0 : i32
    return %c0_i32, %c0_i32_0, %c0_i32_1 : i32, i32, i32
  }
  func.func @transform_1(%arg0: i32) -> (i32, i32, i32) {
    %c0_i32 = arith.constant 0 : i32
    %c0_i32_0 = arith.constant 0 : i32
    %c0_i32_1 = arith.constant 0 : i32
    %c0_i32_2 = arith.constant 0 : i32
    return %c0_i32, %c0_i32_0, %c0_i32_1 : i32, i32, i32
  }
  func.func @transform_2(%arg0: i32) -> (i32, i32) {
    %c0_i32 = arith.constant 0 : i32
    %c0_i32_0 = arith.constant 0 : i32
    %c0_i32_1 = arith.constant 0 : i32
    return %c0_i32, %c0_i32_0 : i32, i32
  }
  func.func @transform_3(%arg0: i32) -> (i32, i32, i32) {
    %c0_i32 = arith.constant 0 : i32
    %c0_i32_0 = arith.constant 0 : i32
    %c0_i32_1 = arith.constant 0 : i32
    %c0_i32_2 = arith.constant 0 : i32
    return %c0_i32, %c0_i32_0, %c0_i32_1 : i32, i32, i32
  }
}

</mosaic_0001>

<bundles_post_ra>
// kernel: tpu_custom_call.1
= control target key start
LH: loop header
LB: loop body
LE: loop exit
PB: predicated region body
PF: predicated region fallthrough
CT: control target
= control target key end

     0   :  { %v599_v1 = vmov 0.0   ;;  %vm600_vm0 = vmmov 0   ;;  %vm49_vm1 = vcmask 523264   ;;  %s742_s0 = inlined_call_operand.vmem [shape: bf16[4,64,32], index: 0, kind: input, shape index: {}]   ;;  %s743_s1 = inlined_call_operand.vmem [shape: bf16[4,8,64], index: 1, kind: input, shape index: {}]   ;;  %s744_s2 = inlined_call_operand.vmem [shape: f32[8,2], index: 2, kind: input, shape index: {}]   ;;  %s745_s3 = inlined_call_operand.hbm [shape: f32[4,8,32], index: 3, kind: output, shape index: {}]  }
   0x1   :  { %v549_v0 = vld [vmem:[%s742_s0] sm:$0xff]   ;;  %490 = vmatprep.subr.bf16.mxu0 %v599_v1  ;;  %502 = vmatprep.subr.bf16.mxu1 %v599_v1  ;;  %v551_v3 = vld [vmem:[%s742_s0 + $0x8] sm:$0xff]   ;;  %v553_v5 = vld [vmem:[%s742_s0 + $0x10] sm:$0xff]  }
   0x2   :  { %v550_v2 = vld [vmem:[%s742_s0 + $0x20] sm:$0xff]   ;;  %491 = vmatpush3.bf16.msra.mxu0 %v549_v0  ;;  %498 = vmatprep.mubr.msk.bf16.mxu0 %vm600_vm0, %v599_v1  ;;  %v552_v4 = vld [vmem:[%s742_s0 + $0x28] sm:$0xff]   ;;  %v554_v6 = vld [vmem:[%s742_s0 + $0x30] sm:$0xff]  }
   0x3   :  { %503 = vmatpush3.bf16.msra.mxu1 %v550_v2  ;;  %492 = vmatprep.subr.bf16.mxu0 %v599_v1  ;;  %v555_v7 = vld [vmem:[%s742_s0 + $0x18] sm:$0xff]   ;;  %v16_v9 = vld [vmem:[%s743_s1] sm:$0xf]  ;;  %v428_v11 = vld [vmem:[%s743_s1 + $0x4] sm:$0xf] }
   0x4   :  { %504 = vmatprep.subr.bf16.mxu1 %v599_v1  ;;  %510 = vmatprep.mubr.msk.bf16.mxu1 %vm600_vm0, %v599_v1  ;;  %v556_v8 = vld [vmem:[%s742_s0 + $0x38] sm:$0xff]   ;;  %v557_v10 = vld [vmem:[%s742_s0 + $0x40] sm:$0xff]  }
   0x5   :  { %v558_v12 = vld [vmem:[%s742_s0 + $0x60] sm:$0xff]  }
   0x6   :  { %493 = vmatpush3.bf16.msra.mxu0 %v551_v3 }
   0x7   :  { %505 = vmatpush3.bf16.msra.mxu1 %v552_v4  ;;  %494 = vmatprep.subr.bf16.mxu0 %v599_v1 }
   0x8   :  { %506 = vmatprep.subr.bf16.mxu1 %v599_v1 }
   0xa   :  { %495 = vmatpush3.bf16.msra.mxu0 %v553_v5 }
   0xb   :  { %507 = vmatpush3.bf16.msra.mxu1 %v554_v6  ;;  %496 = vmatprep.subr.bf16.mxu0 %v599_v1 }
   0xc   :  { %508 = vmatprep.subr.bf16.mxu1 %v599_v1 }
   0xe   :  { %497 = vmatpush3.bf16.msra.mxu0 %v555_v7 }
   0xf   :  { %509 = vmatpush3.bf16.msra.mxu1 %v556_v8  ;;  %514 = vmatprep.subr.bf16.mxu0 %v599_v1 }
  0x10   :  { %526 = vmatprep.subr.bf16.mxu1 %v599_v1 }
  0x11   :  { %499 = vmatmul.mubr.msk.bf16.vlgmr.msra.gmra.mrb[0].mxu0 %vm49_vm1, %v16_v9 }
  0x12   :  { %8 = vsyncpa [#allocation3], 0  ;;  %515 = vmatpush3.bf16.msra.mxu0 %v557_v10  ;;  %511 = vmatmul.mubr.msk.bf16.vlgmr.msra.gmra.mrb[0].mxu1 %vm49_vm1, %v428_v11  ;;  %v559_v13 = vld [vmem:[%s742_s0 + $0x48] sm:$0xff]   ;;  %v561_v15 = vld [vmem:[%s742_s0 + $0x50] sm:$0xff]   ;;  %vm327_vm2 = vcmask 261120   ;;  %v601_v61 = vmov 0  }
  0x13   :  { %527 = vmatpush3.bf16.msra.mxu1 %v558_v12  ;;  %516 = vmatprep.subr.bf16.mxu0 %v599_v1  ;;  %v560_v14 = vld [vmem:[%s742_s0 + $0x68] sm:$0xff]   ;;  %v562_v16 = vld [vmem:[%s742_s0 + $0x70] sm:$0xff]   ;;  %v563_v17 = vld [vmem:[%s742_s0 + $0x58] sm:$0xff]   ;;  %v602_v7 = vmov 1   ;;  %s603_s25 = smov 1  }
  0x14   :  { %528 = vmatprep.subr.bf16.mxu1 %v599_v1  ;;  %522 = vmatprep.mubr.msk.bf16.mxu0 %vm600_vm0, %v599_v1  ;;  %v564_v18 = vld [vmem:[%s742_s0 + $0x78] sm:$0xff]   ;;  %v442_v19 = vld [vmem:[%s743_s1 + $0x8] sm:$0xf]  ;;  %v456_v20 = vld [vmem:[%s743_s1 + $0xc] sm:$0xf] }
  0x15   :  { %534 = vmatprep.mubr.msk.bf16.mxu1 %vm600_vm0, %v599_v1  ;;  %546 = vset.pattern.permute.xlu1 %v601_v61  ;;  %v368_v8 = vld [vmem:[%s744_s2] sm:$0xff]  ;;  %s604_s2 = smov [#allocation2]  }
  0x16   :  { %517 = vmatpush3.bf16.msra.mxu0 %v559_v13  ;;  %548 = vset.pattern.permute.xlu0 %v602_v7  ;;  %s412_s26 = sshll.u32 %s604_s2, 4  ;;  %s413_s26 = int_to_ptr.vmem [resolvable:$true] %s412_s26 }
  0x17   :  { %529 = vmatpush3.bf16.msra.mxu1 %v560_v14  ;;  %518 = vmatprep.subr.bf16.mxu0 %v599_v1  ;;  %s575_s27 = scalar_lea.vmem %s413_s26, 512  ;;  %p580_p1 = scmp.lt.s32.totalorder %s413_s26, %s413_s26 }
  0x18   :  { %530 = vmatprep.subr.bf16.mxu1 %v599_v1  ;;  %p576_p0 = scmp.ne.s32.totalorder %s413_s26, %s575_s27  ;;  %p581_p2 = scmp.lt.s32.totalorder %s575_s27, %s575_s27 }
  0x1a   :  { %519 = vmatpush3.bf16.msra.mxu0 %v561_v15  ;;  %p582_p3 = por %p581_p2, %p580_p1 }
  0x1b   :  { %531 = vmatpush3.bf16.msra.mxu1 %v562_v16  ;;  %520 = vmatprep.subr.bf16.mxu0 %v599_v1 }
  0x1c   :  { %532 = vmatprep.subr.bf16.mxu1 %v599_v1  ;;  %p583_p4 = pnand %p582_p3, %p576_p0 }
  0x1e   :  { %521 = vmatpush3.bf16.msra.mxu0 %v563_v17 }
  0x1f   :  { %533 = vmatpush3.bf16.msra.mxu1 %v564_v18 }
  0x21   :  { %523 = vmatmul.mubr.msk.bf16.vlgmr.msra.gmra.mrb[4].mxu0 %vm49_vm1, %v442_v19 }
  0x22   :  { %535 = vmatmul.mubr.msk.bf16.vlgmr.msra.gmra.mrb[4].mxu1 %vm49_vm1, %v456_v20 }
  0xe4   :  { %v695_v21 = vpop.f32.mrb[0].mxu0 }
  0xe5   :  { %v500_v22 = vpop.f32.mrb[1].mxu0  ;;  %v697_v23 = vpop.f32.mrb[0].mxu1  ;;  %v328_v24 = vsel %vm327_vm2, %v695_v21, 0.0 }
  0xe6   :  { %329 = vadd.xlane.f32.xlu0 %v328_v24  ;;  %v90_v25 = vpop.f32.mrb[2].mxu0  ;;  %v512_v26 = vpop.f32.mrb[1].mxu1  ;;  %v331_v29 = vsel %vm327_vm2, %v697_v23, 0.0 }
  0xe7   :  { %v501_v27 = vpop.f32.mrb[3].mxu0  ;;  %v168_v28 = vpop.f32.mrb[2].mxu1 }
  0xe8   :  { %v513_v30 = vpop.f32.mrb[3].mxu1 }
  0xea   :  { %332 = vadd.xlane.f32.xlu0 %v331_v29 }
  0xf4   :  { %v703_v31 = vpop.f32.mrb[4].mxu0 }
  0xf5   :  { %v524_v32 = vpop.f32.mrb[5].mxu0  ;;  %v705_v33 = vpop.f32.mrb[4].mxu1  ;;  %v335_v34 = vsel %vm327_vm2, %v703_v31, 0.0 }
  0xf6   :  { %v536_v35 = vpop.f32.mrb[5].mxu1  ;;  %336 = vadd.xlane.f32.xlu1 %v335_v34  ;;  %v246_v36 = vpop.f32.mrb[6].mxu0  ;;  %v339_v39 = vsel %vm327_vm2, %v705_v33, 0.0 }
  0xf7   :  { %v525_v37 = vpop.f32.mrb[7].mxu0  ;;  %v324_v38 = vpop.f32.mrb[6].mxu1 }
  0xf8   :  { %v537_v40 = vpop.f32.mrb[7].mxu1 }
  0xfa   :  { %340 = vadd.xlane.f32.xlu1 %v339_v39 }
 0x173   :  { %v330_v41 = vpop.xlane.xlu0 %329 }
 0x177   :  { %v333_v42 = vpop.xlane.xlu0 %332 }
 0x178   :  { %v334_v44 = vadd.f32 %v333_v42, %v330_v41 }
 0x183   :  { %v337_v43 = vpop.xlane.xlu1 %336 }
 0x184   :  { %v338_v45 = vadd.f32 %v337_v43, %v334_v44 }
 0x187   :  { %v341_v46 = vpop.xlane.xlu1 %340 }
 0x188   :  { %v342_v47 = vadd.f32 %v341_v46, %v338_v45 }
 0x18a   :  { %v343_v48 = vmul.f32 0.0078125, %v342_v47 }
 0x18c   :  { %v349_v49 = vsub.f32 %v697_v23, %v343_v48  ;;  %v344_v50 = vsub.f32 %v695_v21, %v343_v48  ;;  %v361_v51 = vsub.f32 %v705_v33, %v343_v48  ;;  %v355_v52 = vsub.f32 %v703_v31, %v343_v48 }
 0x18e   :  { %v350_v53 = vmul.f32 %v349_v49, %v349_v49  ;;  %v345_v54 = vmul.f32 %v344_v50, %v344_v50  ;;  %v362_v57 = vmul.f32 %v361_v51, %v361_v51  ;;  %v356_v58 = vmul.f32 %v355_v52, %v355_v52 }
 0x190   :  { %v351_v55 = vsel %vm327_vm2, %v350_v53, 0.0  ;;  %v346_v56 = vsel %vm327_vm2, %v345_v54, 0.0  ;;  %v363_v59 = vsel %vm327_vm2, %v362_v57, 0.0  ;;  %v357_v60 = vsel %vm327_vm2, %v356_v58, 0.0 }
 0x191   :  { %352 = vadd.xlane.f32.xlu1 %v351_v55  ;;  %347 = vadd.xlane.f32.xlu0 %v346_v56 }
 0x195   :  { %364 = vadd.xlane.f32.xlu1 %v363_v59  ;;  %358 = vadd.xlane.f32.xlu0 %v357_v60 }
 0x21e   :  { %v353_v62 = vpop.xlane.xlu1 %352  ;;  %v348_v63 = vpop.xlane.xlu0 %347 }
 0x21f   :  { %v354_v0 = vadd.f32 %v353_v62, %v348_v63 }
 0x222   :  { %v359_v1 = vpop.xlane.xlu0 %358  ;;  %v365_v3 = vpop.xlane.xlu1 %364 }
 0x223   :  { %v360_v2 = vadd.f32 %v359_v1, %v354_v0 }
 0x225   :  { %v366_v4 = vadd.f32 %v365_v3, %v360_v2 }
 0x227   :  { %v367_v5 = vmul.f32 0.0078125, %v366_v4 }
 0x229   :  { %v369_v6 = vadd.f32 1e-05, %v367_v5 }
 0x22b   :  { %565 = vrsqrt.f32 %v369_v6 }
 0x235   :  { %v566_v9 = vpop.eup %565 }
 0x236   :  { %v371_v10 = vmul.f32 %v566_v9, %v368_v8 }
 0x238   :  { %380 = vperm.xlu1 %546, %v371_v10   ;;  %v372_v11 = vmul.f32 %v371_v10, %v343_v48 }
 0x23a   :  { %374 = vrot.lane.b32.xlu0 %v372_v11, %s603_s25 }
 0x23c   :  { %547 = vset.pattern.permute.xlu1 %v602_v7 }
 0x2ac   :  { %v375_v12 = vpop.permute.xlu0 %374 }
 0x2ad   :  { %v377_v13 = vsub.f32 %v368_v8, %v375_v12 }
 0x2af   :  { %386 = vperm.xlu1 %547, %v377_v13  }
 0x2b7   :  { %v381_v14 = vpop.permute.xlu1 %380 }
 0x2b8   :  { %v383_v15 = vmul.f32 %v381_v14, %v695_v21  ;;  %v392_v16 = vmul.f32 %v381_v14, %v697_v23  ;;  %v397_v17 = vmul.f32 %v381_v14, %v703_v31  ;;  %v402_v18 = vmul.f32 %v381_v14, %v705_v33 }
 0x32e   :  { %v387_v19 = vpop.permute.xlu1 %386 }
 0x32f   :  { %v389_v20 = vadd.f32 %v387_v19, %v383_v15  ;;  %v393_v22 = vadd.f32 %v392_v16, %v387_v19  ;;  %v398_v24 = vadd.f32 %v397_v17, %v387_v19  ;;  %v403_v25 = vadd.f32 %v402_v18, %v387_v19 }
 0x331   :  { %567 = vtanh.f32 %v389_v20 }
 0x332   :  { %569 = vtanh.f32 %v393_v22 }
 0x333   :  { %571 = vtanh.f32 %v398_v24 }
 0x334   :  { %573 = vtanh.f32 %v403_v25 }
 0x33b   :  { %v568_v26 = vpop.eup %567 }
 0x33c   :  { %v570_v27 = vpop.eup %569  ;;  %391 = vst.msk [vmem:[#allocation2] sm:$0xff] %vm327_vm2, %v568_v26 }
 0x33d   :  { %v572_v21 = vpop.eup %571  ;;  %396 = vst.msk [vmem:[#allocation2 + $0x8] sm:$0xff] %vm327_vm2, %v570_v27 }
 0x33e   :  { %v574_v23 = vpop.eup %573  ;;  %401 = vst.msk [vmem:[#allocation2 + $0x10] sm:$0xff] %vm327_vm2, %v572_v21 }
 0x33f   :  { %406 = vst.msk [vmem:[#allocation2 + $0x18] sm:$0xff] %vm327_vm2, %v574_v23 }
 0x340   :  { %586 = shalt.err (!%p583_p4)
}
 0x341   :  { %s587_s30 = scalar_lea.hbm %s745_s3, 512 }
 0x342   :  { %p588_p5 = scmp.ne.s32.totalorder %s745_s3, %s587_s30  ;;  %p591_p6 = scmp.lt.u32.totalorder %s587_s30, %s745_s3 }
 0x344   :  { %p593_p7 = pnand %p591_p6, %p588_p5 }
 0x346   :  { %596 = shalt.err (!%p593_p7)
}
 0x347   :  { %s605_s8 = smov 128   ;;  %s606_s9 = smov 8  }
 0x348   :  { %418 = dma.vmem_to_hbm [thread:$0]  %s413_s26, 512, %s745_s3, [#allocation3], %s605_s8, %s605_s8, %s606_s9  }
 0x349   :  { %597 = dma.done.wait [#allocation3], 512  }
 0x34a   :  { %598 = vsyncadd [#allocation3], 4294966784 }
 0x34b   :  { %422 = vsyncpa [#allocation3], 1 }

</bundles_post_ra>
